<compile_context>
chip_gen: v5e
topology: v5e:2x2
jax: 0.10.0
libtpu: 0.0.40
codegen_flags: <defaults>
</compile_context>

<pallas_src>
import functools

import jax
import jax.numpy as jnp
import numpy as np
from jax.experimental import pallas as pl
from jax.experimental.pallas import tpu as pltpu  # noqa: F401  (TPU backend)


def _simcom_kernel(x_ref, w_ref, o_ref, *, n_head, d_v, inv_temperature):
    # x_ref: (sz_b, len_q, d_model)
    # w_ref: (d_model, n_head*d_v)
    # o_ref: (n_head, sz_b, len_q, len_q)
    sz_b, len_q, d_model = x_ref.shape

    # --- one wide projection over the flattened batch ----------------------
    x2 = x_ref[...].reshape(sz_b * len_q, d_model)            # (B*L, D)
    w = w_ref[...]                                            # (D, H*dv)
    proj = jnp.dot(x2, w, preferred_element_type=jnp.float32)  # (B*L, H*dv)
    proj = proj.reshape(sz_b, len_q, n_head * d_v)             # (B, L, H*dv)

    # --- per-head self-similarity (batched over B, NT form, single operand) -
    sims = []
    for h in range(n_head):  # small n_head -> unrolled at trace time
        ph = proj[:, :, h * d_v:(h + 1) * d_v]                 # (B, L, dv)
        sims.append(jnp.einsum("bqd,bkd->bqk", ph, ph,
                               preferred_element_type=jnp.float32))  # (B, L, L)

    # Stack heads leading (head-major, matches torch ordering) and scale once.
    attn = jnp.stack(sims, axis=0) * inv_temperature           # (H, B, L, L)

    # --- batched log_softmax over the last (lane) axis ----------------------
    m = jnp.max(attn, axis=-1, keepdims=True)
    shifted = attn - m
    lse = jnp.log(jnp.sum(jnp.exp(shifted), axis=-1, keepdims=True))
    log_attn = shifted - lse

    # --- zero the diagonal (== * (1 - eye)), mask built once, broadcast -----
    row = jax.lax.broadcasted_iota(jnp.int32, (len_q, len_q), 0)
    col = jax.lax.broadcasted_iota(jnp.int32, (len_q, len_q), 1)
    log_attn = jnp.where(row == col, 0.0, log_attn)            # (H, B, L, L)

    # --- single assembled store ---------------------------------------------
    o_ref[...] = log_attn.astype(o_ref.dtype)


def simcom_forward(q, w_qs, n_head, d_v):
    """q: (sz_b, len_q, d_model); w_qs: (d_model, n_head*d_v).
    Returns (n_head*sz_b, len_q, len_q) float32 (head-major, as in torch)."""
    sz_b, len_q, d_model = q.shape
    inv_temperature = float(1.0 / np.power(d_v, 0.5))

    kernel = functools.partial(
        _simcom_kernel, n_head=n_head, d_v=d_v, inv_temperature=inv_temperature)

    out_elems = n_head * sz_b * len_q * len_q
    flops = (2 * sz_b * len_q * d_model * n_head * d_v        # projection
             + 2 * n_head * sz_b * len_q * len_q * d_v)       # similarities
    cost = pl.CostEstimate(
        flops=flops,
        transcendentals=out_elems,                            # exp in softmax
        bytes_accessed=(q.size + w_qs.size + out_elems) * 4)

    out = pl.pallas_call(
        kernel,
        out_shape=jax.ShapeDtypeStruct((n_head, sz_b, len_q, len_q), jnp.float32),
        cost_estimate=cost,
    )(q, w_qs)

    # (H, B, L, L) -> (H*B, L, L): identical ordering to torch's
    # permute(2,0,1,3).contiguous().view(-1, L, dv) batch index (h*sz_b + b).
    return out.reshape(n_head * sz_b, len_q, len_q)


def simcom_reference(q, w_qs, n_head, d_v):
    """Pure-JAX reference matching the PyTorch forward."""
    sz_b, len_q, d_model = q.shape
    temperature = np.power(d_v, 0.5)
    proj = jnp.einsum("bld,dk->blk", q, w_qs)                 # (b, l, H*dv)
    proj = proj.reshape(sz_b, len_q, n_head, d_v)
    proj = jnp.transpose(proj, (2, 0, 1, 3)).reshape(-1, len_q, d_v)
    attn = jnp.einsum("bid,bjd->bij", proj, proj) / temperature
    log_attn = jax.nn.log_softmax(attn, axis=2)
    mask = 1.0 - jnp.eye(len_q, dtype=log_attn.dtype)
    return log_attn * mask


if __name__ == "__main__":
    # Module hyperparameters (small, consistent with the forward pass).
    n_head = 4
    d_model = 32
    d_v = 16
    sz_b = 2
    len_q = 8

    key = jax.random.PRNGKey(0)
    k_x, k_w = jax.random.split(key)

    # Input q: (sz_b, len_q, d_model)
    q = jax.random.normal(k_x, (sz_b, len_q, d_model), dtype=jnp.float32)

    # Deterministic weight init: normal(0, sqrt(2/(d_model + d_v))),
    # stored as (d_model, n_head*d_v) (transpose of torch's Linear weight).
    std = np.sqrt(2.0 / (d_model + d_v))
    w_qs = std * jax.random.normal(k_w, (d_model, n_head * d_v), dtype=jnp.float32)

    out = simcom_forward(q, w_qs, n_head, d_v)
    out = jax.block_until_ready(out)

    ref = simcom_reference(q, w_qs, n_head, d_v)
    assert out.shape == (n_head * sz_b, len_q, len_q)
    np.testing.assert_allclose(np.asarray(out), np.asarray(ref), rtol=1e-5, atol=1e-5)

    print("KERNEL_OK")
</pallas_src>

<mosaic_0001>
module attributes {stable_mosaic.version = 11 : i64} {
  func.func @_simcom_kernel(%arg0: memref<2x8x32xf32, #tpu.memory_space<vmem>>, %arg1: memref<32x64xf32, #tpu.memory_space<vmem>>, %arg2: memref<4x2x8x8xf32, #tpu.memory_space<vmem>>) attributes {dimension_semantics = [], scalar_prefetch = 0 : i64, scratch_operands = 0 : i64, tpu.core_type = #tpu.core_type<tc>} {
    %c0 = arith.constant 0 : index
    %c0_0 = arith.constant 0 : index
    %c0_1 = arith.constant 0 : index
    %0 = vector.load %arg0[%c0, %c0_0, %c0_1] : memref<2x8x32xf32, #tpu.memory_space<vmem>>, vector<2x8x32xf32>
    %1 = vector.shape_cast %0 : vector<2x8x32xf32> to vector<16x32xf32>
    %c0_2 = arith.constant 0 : index
    %c0_3 = arith.constant 0 : index
    %2 = vector.load %arg1[%c0_2, %c0_3] : memref<32x64xf32, #tpu.memory_space<vmem>>, vector<32x64xf32>
    %cst = arith.constant dense<0.000000e+00> : vector<16x64xf32>
    %3 = tpu.matmul %1, %2, %cst {dimension_numbers = #tpu.dot_dimension_numbers<[1], [0], [0], [1], [0, 0, 1, 1], [], []>} : vector<16x32xf32>, vector<32x64xf32>, vector<16x64xf32> -> vector<16x64xf32>
    %4 = vector.shape_cast %3 : vector<16x64xf32> to vector<2x8x64xf32>
    %5 = vector.extract_strided_slice %4 {offsets = [0, 0, 0], sizes = [2, 8, 16], strides = [1, 1, 1]} : vector<2x8x64xf32> to vector<2x8x16xf32>
    "tpu.trace_start"() <{level = 10 : i32, message = "bqd,bkd->bqk"}> : () -> ()
    %cst_4 = arith.constant dense<0.000000e+00> : vector<2x8x8xf32>
    %6 = tpu.matmul %5, %5, %cst_4 {dimension_numbers = #tpu.dot_dimension_numbers<[2], [2], [1], [1], [0, 0, 0, 1, 1, 1], [0], [0]>} : vector<2x8x16xf32>, vector<2x8x16xf32>, vector<2x8x8xf32> -> vector<2x8x8xf32>
    "tpu.trace_stop"() : () -> ()
    %7 = vector.extract_strided_slice %4 {offsets = [0, 0, 16], sizes = [2, 8, 16], strides = [1, 1, 1]} : vector<2x8x64xf32> to vector<2x8x16xf32>
    "tpu.trace_start"() <{level = 10 : i32, message = "bqd,bkd->bqk"}> : () -> ()
    %cst_5 = arith.constant dense<0.000000e+00> : vector<2x8x8xf32>
    %8 = tpu.matmul %7, %7, %cst_5 {dimension_numbers = #tpu.dot_dimension_numbers<[2], [2], [1], [1], [0, 0, 0, 1, 1, 1], [0], [0]>} : vector<2x8x16xf32>, vector<2x8x16xf32>, vector<2x8x8xf32> -> vector<2x8x8xf32>
    "tpu.trace_stop"() : () -> ()
    %9 = vector.extract_strided_slice %4 {offsets = [0, 0, 32], sizes = [2, 8, 16], strides = [1, 1, 1]} : vector<2x8x64xf32> to vector<2x8x16xf32>
    "tpu.trace_start"() <{level = 10 : i32, message = "bqd,bkd->bqk"}> : () -> ()
    %cst_6 = arith.constant dense<0.000000e+00> : vector<2x8x8xf32>
    %10 = tpu.matmul %9, %9, %cst_6 {dimension_numbers = #tpu.dot_dimension_numbers<[2], [2], [1], [1], [0, 0, 0, 1, 1, 1], [0], [0]>} : vector<2x8x16xf32>, vector<2x8x16xf32>, vector<2x8x8xf32> -> vector<2x8x8xf32>
    "tpu.trace_stop"() : () -> ()
    %11 = vector.extract_strided_slice %4 {offsets = [0, 0, 48], sizes = [2, 8, 16], strides = [1, 1, 1]} : vector<2x8x64xf32> to vector<2x8x16xf32>
    "tpu.trace_start"() <{level = 10 : i32, message = "bqd,bkd->bqk"}> : () -> ()
    %cst_7 = arith.constant dense<0.000000e+00> : vector<2x8x8xf32>
    %12 = tpu.matmul %11, %11, %cst_7 {dimension_numbers = #tpu.dot_dimension_numbers<[2], [2], [1], [1], [0, 0, 0, 1, 1, 1], [0], [0]>} : vector<2x8x16xf32>, vector<2x8x16xf32>, vector<2x8x8xf32> -> vector<2x8x8xf32>
    "tpu.trace_stop"() : () -> ()
    %13 = vector.shape_cast %6 : vector<2x8x8xf32> to vector<1x2x8x8xf32>
    %14 = vector.shape_cast %8 : vector<2x8x8xf32> to vector<1x2x8x8xf32>
    %15 = vector.shape_cast %10 : vector<2x8x8xf32> to vector<1x2x8x8xf32>
    %16 = vector.shape_cast %12 : vector<2x8x8xf32> to vector<1x2x8x8xf32>
    %17 = tpu.concatenate %13, %14, %15, %16 in 0 : vector<1x2x8x8xf32>, vector<1x2x8x8xf32>, vector<1x2x8x8xf32>, vector<1x2x8x8xf32> -> vector<4x2x8x8xf32>
    %cst_8 = arith.constant 2.500000e-01 : f32
    %18 = vector.broadcast %cst_8 : f32 to vector<4x2x8x8xf32>
    %19 = arith.mulf %17, %18 : vector<4x2x8x8xf32>
    %cst_9 = arith.constant dense<0xFF800000> : vector<4x2x8xf32>
    %20 = vector.multi_reduction <maximumf>, %19, %cst_9 [3] : vector<4x2x8x8xf32> to vector<4x2x8xf32>
    %21 = vector.shape_cast %20 : vector<4x2x8xf32> to vector<4x2x8x1xf32>
    %22 = vector.broadcast %21 : vector<4x2x8x1xf32> to vector<4x2x8x8xf32>
    %23 = arith.subf %19, %22 : vector<4x2x8x8xf32>
    %24 = math.exp %23 : vector<4x2x8x8xf32>
    %cst_10 = arith.constant dense<0.000000e+00> : vector<4x2x8xf32>
    %25 = vector.multi_reduction <add>, %24, %cst_10 [3] : vector<4x2x8x8xf32> to vector<4x2x8xf32>
    %26 = vector.shape_cast %25 : vector<4x2x8xf32> to vector<4x2x8x1xf32>
    %27 = math.log %26 : vector<4x2x8x1xf32>
    %28 = vector.broadcast %27 : vector<4x2x8x1xf32> to vector<4x2x8x8xf32>
    %29 = arith.subf %23, %28 : vector<4x2x8x8xf32>
    %30 = tpu.iota {dimensions = array<i32: 0>} : vector<8x8xi32>
    %31 = tpu.iota {dimensions = array<i32: 1>} : vector<8x8xi32>
    %32 = arith.cmpi eq, %30, %31 : vector<8x8xi32>
    %cst_11 = arith.constant 0.000000e+00 : f32
    %33 = vector.shape_cast %32 : vector<8x8xi1> to vector<1x1x8x8xi1>
    %34 = vector.broadcast %33 : vector<1x1x8x8xi1> to vector<4x2x8x8xi1>
    %35 = vector.broadcast %cst_11 : f32 to vector<4x2x8x8xf32>
    %36 = arith.select %34, %35, %29 : vector<4x2x8x8xi1>, vector<4x2x8x8xf32>
    %c0_12 = arith.constant 0 : index
    %c0_13 = arith.constant 0 : index
    %c0_14 = arith.constant 0 : index
    %c0_15 = arith.constant 0 : index
    %37 = vector.load %arg2[%c0_12, %c0_13, %c0_14, %c0_15] : memref<4x2x8x8xf32, #tpu.memory_space<vmem>>, vector<4x2x8x8xf32>
    tpu.vector_store %arg2[%c0_12, %c0_13, %c0_14, %c0_15], %36 {strides = array<i32>} : memref<4x2x8x8xf32, #tpu.memory_space<vmem>>, vector<4x2x8x8xf32>,
    return
  }
}

</mosaic_0001>

<bundles_post_ra>
// kernel: tpu_custom_call.1
= control target key start
LH: loop header
LB: loop body
LE: loop exit
PB: predicated region body
PF: predicated region fallthrough
CT: control target
= control target key end

     0   :  { %7 = vsyncpa [#allocation3], 0  ;;  %s688_s0 = inlined_call_operand.hbm [shape: f32[2,8,32], index: 0, kind: input, shape index: {}]   ;;  %s689_s1 = inlined_call_operand.hbm [shape: f32[32,64], index: 1, kind: input, shape index: {}]   ;;  %s690_s2 = inlined_call_operand.hbm [shape: f32[4,2,8,8], index: 2, kind: output, shape index: {}]  }
   0x1   :  { %8 = vsyncpa [#allocation6], 0 }
   0x2   :  { %9 = vsyncpa [#allocation4], 0  ;;  %s14_s11 = sshll.u32 %s688_s0, 4  ;;  %s555_s12 = smov [#allocation2]   ;;  %s15_s11 = int_to_ptr.hbm [resolvable:$true] %s14_s11 }
   0x3   :  { %s16_s13 = sshll.u32 %s555_s12, 4  ;;  %s27_s16 = sshll.u32 %s689_s1, 4  ;;  %s17_s13 = int_to_ptr.vmem [resolvable:$true] %s16_s13  ;;  %s28_s16 = int_to_ptr.hbm [resolvable:$true] %s27_s16 }
   0x4   :  { %s556_s17 = smov 128   ;;  %s557_s18 = smov 8  }
   0x5   :  { %22 = dma.hbm_to_vmem [thread:$0]  %s15_s11, 256, %s17_s13, [#allocation3], %s556_s17, %s556_s17, %s557_s18  }
   0x6   :  { %s558_s19 = smov [#allocation5]  }
   0x7   :  { %s29_s20 = sshll.u32 %s558_s19, 4  ;;  %s30_s20 = int_to_ptr.vmem [resolvable:$true] %s29_s20 }
   0x8   :  { %35 = dma.hbm_to_vmem [thread:$0]  %s28_s16, 512, %s30_s20, [#allocation6], %s556_s17, %s556_s17, %s557_s18  }
   0x9   :  { %549 = dma.done.wait [#allocation3], 256  }
   0xa   :  { %550 = vsyncadd [#allocation3], 4294967040 }
   0xb   :  { %551 = dma.done.wait [#allocation6], 512  }
   0xc   :  { %552 = vsyncadd [#allocation6], 4294966784  ;;  %v49_v0 = vld [vmem:[#allocation5 + $0x18] sm:$0xff]  ;;  %v48_v1 = vld [vmem:[#allocation5 + $0x10] sm:$0xff]  ;;  %vm50_vm0 = vcmask 261120   ;;  %vm80_vm1 = vcmask 130048  }
   0xd   :  { %69 = vmatpush.msra.mxu0 %v49_v0  ;;  %v47_v2 = vld [vmem:[#allocation5 + $0x8] sm:$0xff]  ;;  %v46_v3 = vld [vmem:[#allocation5] sm:$0xff]  ;;  %v44_v4 = vld [vmem:[#allocation2] sm:$0xff]  ;;  %s559_s0 = smov 112   ;;  %s560_s1 = smov 96   ;;  %vm279_vm2 = vcmask 64512  }
   0xe   :  { %v45_v5 = vld [vmem:[#allocation2 + $0x8] sm:$0xff]  ;;  %s561_s21 = smov 80   ;;  %s562_s22 = smov [#allocation7]  }
   0xf   :  { %70 = vmatpush.msra.mxu0 %v48_v1  ;;  %s403_s23 = sshll.u32 %s562_s22, 4  ;;  %s405_s26 = sshll.u32 %s690_s2, 4  ;;  %s404_s23 = int_to_ptr.vmem [resolvable:$true] %s403_s23  ;;  %s406_s26 = int_to_ptr.hbm [resolvable:$true] %s405_s26 }
  0x11   :  { %71 = vmatpush.msra.mxu0 %v47_v2 }
  0x13   :  { %72 = vmatpush.msra.mxu0 %v46_v3 }
  0x14   :  { %419 = vmatmul.msk.f32.vlgmr.msra.gmra.mxu0 %vm50_vm0, %v44_v4 }
  0x1c   :  { %420 = vmatmul.msk.f32.gmra.mxu0 %vm50_vm0, %v45_v5 }
  0x91   :  { %v74_v6 = vpop.f32.mrf.mxu0 }
  0x92   :  { %127 = vrot.lane.b32.xlu0 %v74_v6, %s559_s0  ;;  %421 = vmatpush.xpose.msk.msra.mxu1 %vm80_vm1, %v74_v6 }
  0x95   :  { %422 = vmatmul.msk.f32.vlgmr.msra.gmra.mxu1 %vm80_vm1, %v74_v6 }
  0x99   :  { %v77_v7 = vpop.f32.mrf.mxu0 }
  0x9a   :  { %175 = vrot.lane.b32.xlu0 %v74_v6, %s560_s1  ;;  %247 = vrot.lane.b32.xlu2 %v77_v7, %s561_s21 }
  0x9b   :  { %151 = vrot.lane.b32.xlu1 %v77_v7, %s559_s0  ;;  %423 = vmatpush.xpose.msk.msra.mxu2 %vm80_vm1, %v77_v7 }
  0x9e   :  { %424 = vmatmul.msk.f32.vlgmr.msra.gmra.mxu2 %vm80_vm1, %v77_v7 }
  0xa2   :  { %223 = vrot.lane.b32.xlu2 %v74_v6, %s561_s21 }
  0xa3   :  { %199 = vrot.lane.b32.xlu1 %v77_v7, %s560_s1 }
  0xf4   :  { %v248_v8 = vpop.permute.xlu2 %247 }
  0xfc   :  { %v224_v12 = vpop.permute.xlu2 %223 }
 0x104   :  { %v128_v9 = vpop.permute.xlu0 %127 }
 0x105   :  { %425 = vmatpush.xpose.msk.msra.mxu3 %vm80_vm1, %v128_v9 }
 0x108   :  { %426 = vmatmul.msk.f32.vlgmr.msra.gmra.mxu3 %vm80_vm1, %v128_v9  ;;  %v376_v9 = vlaneseq }
 0x10c   :  { %v176_v10 = vpop.permute.xlu0 %175 }
 0x10d   :  { %v152_v11 = vpop.permute.xlu1 %151  ;;  %429 = vmatpush.xpose.msk.msrb.mxu2 %vm80_vm1, %v176_v10 }
 0x10e   :  { %427 = vmatpush.xpose.msk.msrb.mxu1 %vm80_vm1, %v152_v11 }
 0x110   :  { %430 = vmatmul.msk.f32.vlgmr.msrb.gmra.mxu2 %vm80_vm1, %v176_v10 }
 0x111   :  { %435 = vmatpush.xpose.msk.msra.mxu2 %vm80_vm1, %v248_v8  ;;  %428 = vmatmul.msk.f32.vlgmr.msrb.gmra.mxu1 %vm80_vm1, %v152_v11 }
 0x112   :  { %433 = vmatpush.xpose.msk.msra.mxu1 %vm80_vm1, %v224_v12  ;;  %v101_v13 = vpop.f32.mrf.mxu1 }
 0x113   :  { %v271_v14 = vmul.f32 0.25, %v101_v13 }
 0x115   :  { %v200_v15 = vpop.permute.xlu1 %199  ;;  %v280_v16 = vsel %vm279_vm2, %v271_v14, -inf }
 0x116   :  { %431 = vmatpush.xpose.msk.msrb.mxu3 %vm80_vm1, %v200_v15  ;;  %281 = vmax.xlane.f32.xlu0 %v280_v16  ;;  %v379_v16 = vand.u32 127, %v376_v9 }
 0x118   :  { %436 = vmatmul.msk.f32.vlgmr.msra.gmra.mxu2 %vm80_vm1, %v248_v8 }
 0x119   :  { %432 = vmatmul.msk.f32.vlgmr.msrb.gmra.mxu3 %vm80_vm1, %v200_v15  ;;  %434 = vmatmul.msk.f32.vlgmr.msra.gmra.mxu1 %vm80_vm1, %v224_v12  ;;  %v377_v15 = vshrl.u32 %v376_v9, 7 }
 0x11b   :  { %vm646_vm3 = vcmp.eq.s32.totalorder %v377_v15, %v379_v16 }
 0x121   :  { %v124_v17 = vpop.f32.mrf.mxu2 }
 0x122   :  { %v272_v18 = vmul.f32 0.25, %v124_v17 }
 0x124   :  { %v283_v19 = vsel %vm279_vm2, %v272_v18, -inf }
 0x125   :  { %284 = vmax.xlane.f32.xlu1 %v283_v19 }
 0x189   :  { %v282_v25 = vpop.xlane.xlu0 %281 }
 0x18a   :  { %v609_v28 = vsub.f32 %v271_v14, %v282_v25 }
 0x18b   :  { %v148_v20 = vpop.f32.mrf.mxu3 }
 0x18c   :  { %v273_v21 = vmul.f32 0.25, %v148_v20  ;;  %v312_v34 = vmul.f32 1.442695, %v609_v28 }
 0x18e   :  { %v172_v22 = vpop.f32.mrf.mxu1  ;;  %v286_v23 = vsel %vm279_vm2, %v273_v21, -inf }
 0x18f   :  { %287 = vmax.xlane.f32.xlu2 %v286_v23  ;;  %v274_v24 = vmul.f32 0.25, %v172_v22 }
 0x191   :  { %v289_v29 = vsel %vm279_vm2, %v274_v24, -inf }
 0x193   :  { %v196_v26 = vpop.f32.mrf.mxu2 }
 0x194   :  { %v275_v27 = vmul.f32 0.25, %v196_v26 }
 0x196   :  { %v292_v30 = vsel %vm279_vm2, %v275_v27, -inf  ;;  %v244_v31 = vpop.f32.mrf.mxu1 }
 0x197   :  { %290 = vmax.xlane.f32.xlu2 %v289_v29  ;;  %293 = vmax.xlane.f32.xlu0 %v292_v30  ;;  %v277_v35 = vmul.f32 0.25, %v244_v31 }
 0x198   :  { %v285_v32 = vpop.xlane.xlu1 %284 }
 0x199   :  { %v613_v33 = vsub.f32 %v272_v18, %v285_v32  ;;  %v298_v41 = vsel %vm279_vm2, %v277_v35, -inf }
 0x19b   :  { %v314_v36 = vmul.f32 1.442695, %v613_v33  ;;  %v268_v37 = vpop.f32.mrf.mxu2 }
 0x19c   :  { %v220_v38 = vpop.f32.mrf.mxu3  ;;  %v278_v39 = vmul.f32 0.25, %v268_v37 }
 0x19d   :  { %445 = vpow2.f32 %v314_v36  ;;  %v276_v40 = vmul.f32 0.25, %v220_v38 }
 0x19e   :  { %447 = vpow2.f32 %v312_v34  ;;  %v301_v42 = vsel %vm279_vm2, %v278_v39, -inf }
 0x19f   :  { %299 = vmax.xlane.f32.xlu2 %v298_v41  ;;  %v295_v43 = vsel %vm279_vm2, %v276_v40, -inf  ;;  %302 = vmax.xlane.f32.xlu0 %v301_v42 }
 0x1a0   :  { %296 = vmax.xlane.f32.xlu1 %v295_v43 }
 0x1a3   :  { %v446_v44 = vpop.eup %445 }
 0x1a4   :  { %v448_v45 = vpop.eup %447  ;;  %v331_v46 = vsel %vm279_vm2, %v446_v44, 0.0 }
 0x1a5   :  { %v328_v47 = vsel %vm279_vm2, %v448_v45, 0.0 }
 0x1a7   :  { %332 = vadd.xlane.f32.xlu2 %v331_v46 }
 0x1a8   :  { %329 = vadd.xlane.f32.xlu1 %v328_v47 }
 0x202   :  { %v288_v48 = vpop.xlane.xlu2 %287 }
 0x203   :  { %v622_v49 = vsub.f32 %v273_v21, %v288_v48 }
 0x205   :  { %v316_v50 = vmul.f32 1.442695, %v622_v49 }
 0x207   :  { %449 = vpow2.f32 %v316_v50 }
 0x20a   :  { %v291_v51 = vpop.xlane.xlu2 %290  ;;  %v294_v52 = vpop.xlane.xlu0 %293 }
 0x20b   :  { %v625_v53 = vsub.f32 %v274_v24, %v291_v51  ;;  %v627_v54 = vsub.f32 %v275_v27, %v294_v52 }
 0x20d   :  { %v450_v55 = vpop.eup %449  ;;  %v318_v56 = vmul.f32 1.442695, %v625_v53  ;;  %v320_v57 = vmul.f32 1.442695, %v627_v54 }
 0x20e   :  { %v334_v58 = vsel %vm279_vm2, %v450_v55, 0.0 }
 0x20f   :  { %451 = vpow2.f32 %v318_v56  ;;  %335 = vadd.xlane.f32.xlu0 %v334_v58 }
 0x210   :  { %453 = vpow2.f32 %v320_v57 }
 0x212   :  { %v300_v59 = vpop.xlane.xlu2 %299  ;;  %v303_v60 = vpop.xlane.xlu0 %302 }
 0x213   :  { %v632_v61 = vsub.f32 %v277_v35, %v300_v59  ;;  %v297_v62 = vpop.xlane.xlu1 %296  ;;  %v634_v63 = vsub.f32 %v278_v39, %v303_v60 }
 0x214   :  { %v636_v0 = vsub.f32 %v276_v40, %v297_v62 }
 0x215   :  { %v452_v1 = vpop.eup %451  ;;  %v324_v2 = vmul.f32 1.442695, %v632_v61  ;;  %v326_v3 = vmul.f32 1.442695, %v634_v63 }
 0x216   :  { %v454_v4 = vpop.eup %453  ;;  %v322_v5 = vmul.f32 1.442695, %v636_v0  ;;  %v337_v6 = vsel %vm279_vm2, %v452_v1, 0.0 }
 0x217   :  { %455 = vpow2.f32 %v324_v2  ;;  %338 = vadd.xlane.f32.xlu1 %v337_v6  ;;  %v340_v7 = vsel %vm279_vm2, %v454_v4, 0.0 }
 0x218   :  { %457 = vpow2.f32 %v322_v5  ;;  %341 = vadd.xlane.f32.xlu2 %v340_v7 }
 0x219   :  { %459 = vpow2.f32 %v326_v3 }
 0x21a   :  { %v333_v8 = vpop.xlane.xlu2 %332 }
 0x21b   :  { %461 = vlog2.f32 %v333_v8  ;;  %v330_v10 = vpop.xlane.xlu1 %329 }
 0x21c   :  { %463 = vlog2.f32 %v330_v10 }
 0x21d   :  { %v456_v11 = vpop.eup %455 }
 0x21e   :  { %v458_v12 = vpop.eup %457  ;;  %v346_v13 = vsel %vm279_vm2, %v456_v11, 0.0 }
 0x21f   :  { %v460_v14 = vpop.eup %459  ;;  %347 = vadd.xlane.f32.xlu1 %v346_v13  ;;  %v343_v17 = vsel %vm279_vm2, %v458_v12, 0.0 }
 0x220   :  { %344 = vadd.xlane.f32.xlu0 %v343_v17  ;;  %v349_v18 = vsel %vm279_vm2, %v460_v14, 0.0 }
 0x221   :  { %v462_v19 = vpop.eup %461  ;;  %350 = vadd.xlane.f32.xlu2 %v349_v18 }
 0x222   :  { %v464_v20 = vpop.eup %463  ;;  %v355_v21 = vmul.f32 0.6931472, %v462_v19 }
 0x223   :  { %v353_v23 = vmul.f32 0.6931472, %v464_v20 }
 0x224   :  { %v369_v24 = vsub.f32 %v613_v33, %v355_v21 }
 0x225   :  { %v368_v25 = vsub.f32 %v609_v28, %v353_v23 }
 0x226   :  { %v384_v26 = vsel %vm646_vm3, 0.0, %v369_v24 }
 0x227   :  { %392 = vst.msk [vmem:[#allocation7 + $0x8] sm:$0xff] %vm279_vm2, %v384_v26  ;;  %v383_v27 = vsel %vm646_vm3, 0.0, %v368_v25 }
 0x228   :  { %391 = vst.msk [vmem:[#allocation7] sm:$0xff] %vm279_vm2, %v383_v27 }
 0x282   :  { %v336_v29 = vpop.xlane.xlu0 %335 }
 0x283   :  { %465 = vlog2.f32 %v336_v29 }
 0x289   :  { %v466_v30 = vpop.eup %465 }
 0x28a   :  { %v357_v31 = vmul.f32 0.6931472, %v466_v30  ;;  %v339_v32 = vpop.xlane.xlu1 %338 }
 0x28b   :  { %467 = vlog2.f32 %v339_v32  ;;  %v342_v34 = vpop.xlane.xlu2 %341 }
 0x28c   :  { %v370_v33 = vsub.f32 %v622_v49, %v357_v31  ;;  %469 = vlog2.f32 %v342_v34 }
 0x28e   :  { %v385_v28 = vsel %vm646_vm3, 0.0, %v370_v33 }
 0x28f   :  { %393 = vst.msk [vmem:[#allocation7 + $0x10] sm:$0xff] %vm279_vm2, %v385_v28 }
 0x291   :  { %v468_v35 = vpop.eup %467 }
 0x292   :  { %v470_v36 = vpop.eup %469  ;;  %v359_v37 = vmul.f32 0.6931472, %v468_v35  ;;  %v348_v38 = vpop.xlane.xlu1 %347 }
 0x293   :  { %v361_v39 = vmul.f32 0.6931472, %v470_v36  ;;  %471 = vlog2.f32 %v348_v38  ;;  %v345_v40 = vpop.xlane.xlu0 %344 }
 0x294   :  { %v371_v41 = vsub.f32 %v625_v53, %v359_v37  ;;  %v351_v42 = vpop.xlane.xlu2 %350  ;;  %473 = vlog2.f32 %v345_v40 }
 0x295   :  { %v372_v43 = vsub.f32 %v627_v54, %v361_v39  ;;  %475 = vlog2.f32 %v351_v42 }
 0x296   :  { %v386_v44 = vsel %vm646_vm3, 0.0, %v371_v41 }
 0x297   :  { %394 = vst.msk [vmem:[#allocation7 + $0x18] sm:$0xff] %vm279_vm2, %v386_v44  ;;  %v387_v45 = vsel %vm646_vm3, 0.0, %v372_v43 }
 0x298   :  { %395 = vst.msk [vmem:[#allocation7 + $0x20] sm:$0xff] %vm279_vm2, %v387_v45 }
 0x299   :  { %v472_v46 = vpop.eup %471 }
 0x29a   :  { %v474_v47 = vpop.eup %473  ;;  %v365_v48 = vmul.f32 0.6931472, %v472_v46 }
 0x29b   :  { %v476_v49 = vpop.eup %475  ;;  %v363_v50 = vmul.f32 0.6931472, %v474_v47 }
 0x29c   :  { %v374_v51 = vsub.f32 %v632_v61, %v365_v48  ;;  %v367_v52 = vmul.f32 0.6931472, %v476_v49 }
 0x29d   :  { %v373_v53 = vsub.f32 %v636_v0, %v363_v50 }
 0x29e   :  { %v389_v54 = vsel %vm646_vm3, 0.0, %v374_v51  ;;  %v375_v55 = vsub.f32 %v634_v63, %v367_v52 }
 0x29f   :  { %397 = vst.msk [vmem:[#allocation7 + $0x30] sm:$0xff] %vm279_vm2, %v389_v54  ;;  %v388_v56 = vsel %vm646_vm3, 0.0, %v373_v53 }
 0x2a0   :  { %v390_v57 = vsel %vm646_vm3, 0.0, %v375_v55  ;;  %396 = vst.msk [vmem:[#allocation7 + $0x28] sm:$0xff] %vm279_vm2, %v388_v56 }
 0x2a1   :  { %398 = vst.msk [vmem:[#allocation7 + $0x38] sm:$0xff] %vm279_vm2, %v390_v57 }
 0x2a2   :  { %411 = dma.vmem_to_hbm [thread:$0]  %s404_s23, 1024, %s406_s26, [#allocation4], %s556_s17, %s556_s17, %s557_s18  }
 0x2a3   :  { %553 = dma.done.wait [#allocation4], 1024  }
 0x2a4   :  { %554 = vsyncadd [#allocation4], 4294966272 }
 0x2a5   :  { %416 = vsyncpa [#allocation3], 1 }
 0x2a6   :  { %417 = vsyncpa [#allocation6], 1 }
 0x2a7   :  { %418 = vsyncpa [#allocation4], 1 }

</bundles_post_ra>
